<compile_context>
chip_gen: v7x
topology: tpu7x:2x2x1
jax: 0.10.0
libtpu: 0.0.40
codegen_flags: <defaults>
</compile_context>

<pallas_src>
import functools

import jax
import jax.numpy as jnp
from jax.experimental import pallas as pl
from jax.experimental.pallas import tpu as pltpu

_EPS = 1e-10
_TINY = 1e-30


def _split_bf16(x_f32):
    """Split an f32 tile into two bf16 tiles whose sum is f32-accurate (~2^-17 rel)."""
    hi = x_f32.astype(jnp.bfloat16)
    lo = (x_f32 - hi.astype(jnp.float32)).astype(jnp.bfloat16)
    return hi, lo


def _agg_sharpen_kernel(xt_ref, b_ref, dstq_ref, lsrc_ref, acc_ref, *,
                        num_classes, inv_temp, blk):
    """Pass 1: S^T = [x^T; 1] @ B (tiled over k); finalize per-dst-node quantities."""
    k = pl.program_id(1)

    @pl.when(k == 0)
    def _():
        acc_ref[...] = jnp.zeros_like(acc_ref)

    # xt is a VMEM-resident (C+1, Np) f32 strip (DMA'd once); slice this contraction
    # tile and split it into bf16 hi/lo so the MXU runs native bf16 against the
    # int8->bf16 B tile while the accumulated result stays f32-accurate.
    off = pl.multiple_of(k * blk, blk)
    x_blk = xt_ref[:, pl.ds(off, blk)]
    x_hi, x_lo = _split_bf16(x_blk)
    b = b_ref[...].astype(jnp.bfloat16)            # int8 counts, exact in bf16
    acc_ref[...] += (
        jnp.dot(x_hi, b, preferred_element_type=jnp.float32)
        + jnp.dot(x_lo, b, preferred_element_type=jnp.float32))

    @pl.when(k == pl.num_programs(1) - 1)
    def _():
        c = num_classes
        s = acc_ref[...]                           # [C+1, blk]
        sums = s[0:c, :]                           # sum of incoming predictions
        deg = s[c:c + 1, :]                        # in-degree (ones-row trick)
        avg = sums / jnp.maximum(deg, 1.0)         # scatter-mean (0 if deg == 0)
        lsrc_ref[...] = jnp.log(avg + _EPS)
        # sharpen: avg**(1/temp) normalized over classes (EUP exp/log path).
        p = jnp.exp(inv_temp * jnp.log(jnp.maximum(avg, _TINY)))
        denom = jnp.maximum(jnp.sum(p, axis=0, keepdims=True), _TINY)
        d = p / denom + _EPS
        first = deg * jnp.sum(d * jnp.log(d), axis=0, keepdims=True)
        dstq_ref[...] = jnp.concatenate([d, first], axis=0)   # [D^T ; first]


def _cross_reduce_kernel(dstq_ref, lsrc_ref, b_ref, out_ref, acc_ref, *,
                         num_classes, blk):
    """Pass 2: cross^T = Lsrc^T @ B (tiled over k); per-dst-node loss contribution."""
    k = pl.program_id(1)

    @pl.when(k == 0)
    def _():
        acc_ref[...] = jnp.zeros_like(acc_ref)

    off = pl.multiple_of(k * blk, blk)
    l_blk = lsrc_ref[:, pl.ds(off, blk)]           # VMEM-resident log(avg+eps)^T strip
    l_hi, l_lo = _split_bf16(l_blk)
    b = b_ref[...].astype(jnp.bfloat16)
    acc_ref[...] += (
        jnp.dot(l_hi, b, preferred_element_type=jnp.float32)
        + jnp.dot(l_lo, b, preferred_element_type=jnp.float32))

    @pl.when(k == pl.num_programs(1) - 1)
    def _():
        c = num_classes
        d = dstq_ref[0:c, :]
        first = dstq_ref[c:c + 1, :]
        out_ref[...] = first - jnp.sum(d * acc_ref[...], axis=0, keepdims=True)


def neighbor_constrained_reg_loss(edge_index, aug_pred, temp, *, blk=None):
    """Forward pass of NeighborConstrainedRegLoss. Returns a scalar loss."""
    N, C = aug_pred.shape
    num_edges = int(edge_index.shape[1])
    inv_temp = 1.0 / float(temp)

    # Tile size: both passes are HBM-bound on the (blk, blk) int8 B tile, so pick the
    # biggest tile that (a) amortizes the ~0.35 us/step pipeline overhead, (b) keeps
    # >= 2 parallel dst tiles for megacore, (c) keeps padding waste small.  Tunable.
    if blk is None:
        if N >= 4096:
            blk = 2048
        elif N >= 2048:
            blk = 1024
        elif N >= 1024:
            blk = 512
        elif N >= 256:
            blk = 256
        else:
            blk = 128
    Np = pl.cdiv(N, blk) * blk
    n_t = Np // blk

    src = edge_index[0].astype(jnp.int32)
    dst = edge_index[1].astype(jnp.int32)

    # Glue: densify edge list -> B[src, dst] = multiplicity (int8: exact for <= 127
    # duplicate edges; use a bf16 densifier for heavier multigraphs).
    # TODO(synk): CSR + scalar-prefetch gather to make aggregation O(E*C), not O(N^2).
    B = jnp.zeros((Np, Np), jnp.int8).at[src, dst].add(
        jnp.ones((num_edges,), jnp.int8))

    # Class-major (lane-dense) input strip: xt = [x^T ; ones], zero-padded to Np.
    xt = jnp.concatenate(
        [aug_pred.astype(jnp.float32).T, jnp.ones((1, N), jnp.float32)], axis=0)
    xt = jnp.pad(xt, ((0, 0), (0, Np - N)))

    cparams = pltpu.CompilerParams(
        dimension_semantics=("parallel", "arbitrary"),
        vmem_limit_bytes=(48 << 20) if blk >= 2048 else (32 << 20))

    # B BlockSpec shared by both passes; 3-deep buffering only when tiles are small
    # enough that per-tile DMA ~ per-step overhead (unnecessary once blk >= 1024).
    if 256 <= blk <= 512:
        b_spec = pl.BlockSpec((blk, blk), lambda j, k: (k, j),
                              pipeline_mode=pl.Buffered(3))
    else:
        b_spec = pl.BlockSpec((blk, blk), lambda j, k: (k, j))

    kernel1 = functools.partial(_agg_sharpen_kernel,
                                num_classes=C, inv_temp=inv_temp, blk=blk)
    dstq, lsrc = pl.pallas_call(
        kernel1,
        out_shape=(
            jax.ShapeDtypeStruct((C + 1, Np), jnp.float32),   # [D^T ; first-term]
            jax.ShapeDtypeStruct((C, Np), jnp.float32),       # log(avg+eps)^T
        ),
        grid_spec=pltpu.PrefetchScalarGridSpec(
            num_scalar_prefetch=0,
            grid=(n_t, n_t),
            in_specs=[
                # xt strip stays VMEM-resident (single DMA), sliced by k in-kernel.
                pl.BlockSpec((C + 1, Np), lambda j, k: (0, 0)),
                b_spec,
            ],
            out_specs=(
                pl.BlockSpec((C + 1, blk), lambda j, k: (0, j)),
                pl.BlockSpec((C, blk), lambda j, k: (0, j)),
            ),
            scratch_shapes=[pltpu.VMEM((C + 1, blk), jnp.float32)],
        ),
        compiler_params=cparams,
        cost_estimate=pl.CostEstimate(
            flops=4 * Np * Np * (C + 1),
            transcendentals=4 * C * Np,
            bytes_accessed=Np * Np + (C + 1) * Np * 4 + (2 * C + 1) * Np * 4),
    )(xt, B)

    kernel2 = functools.partial(_cross_reduce_kernel, num_classes=C, blk=blk)
    contrib = pl.pallas_call(
        kernel2,
        out_shape=jax.ShapeDtypeStruct((1, Np), jnp.float32),
        grid_spec=pltpu.PrefetchScalarGridSpec(
            num_scalar_prefetch=0,
            grid=(n_t, n_t),
            in_specs=[
                pl.BlockSpec((C + 1, blk), lambda j, k: (0, j)),   # [D^T ; first]
                pl.BlockSpec((C, Np), lambda j, k: (0, 0)),        # resident Lsrc^T
                b_spec,
            ],
            out_specs=pl.BlockSpec((1, blk), lambda j, k: (0, j)),
            scratch_shapes=[pltpu.VMEM((C, blk), jnp.float32)],
        ),
        compiler_params=cparams,
        cost_estimate=pl.CostEstimate(
            flops=4 * Np * Np * C,
            transcendentals=0,
            bytes_accessed=Np * Np + (2 * C + 1) * Np * 4 + Np * 4),
    )(dstq, lsrc, B)

    # Tiny O(N) epilogue; num_edges is a static Python int (guard E == 0).
    return jnp.sum(contrib) / float(max(num_edges, 1))


def _reference_loss(edge_index, aug_pred, temp):
    """Pure-JAX mirror of the PyTorch forward (validation only)."""
    N, C = aug_pred.shape
    src, dst = edge_index[0], edge_index[1]
    msg = aug_pred[src]                                     # x_j
    summed = jnp.zeros((N, C), jnp.float32).at[dst].add(msg)
    count = jnp.zeros((N,), jnp.float32).at[dst].add(1.0)
    avg = summed / jnp.maximum(count, 1.0)[:, None]         # scatter-mean
    p = avg ** (1.0 / temp)
    sharp = p / jnp.sum(p, axis=1, keepdims=True)
    s = (avg + _EPS)[src]
    d = (sharp + _EPS)[dst]
    cr = d * jnp.log(d) - d * jnp.log(s)
    return jnp.mean(jnp.sum(cr, axis=1, keepdims=True))


if __name__ == "__main__":
    N, C, E_EXTRA, TEMP = 32, 8, 48, 0.5

    key = jax.random.PRNGKey(0)
    k1, k2, k3 = jax.random.split(key, 3)

    # aug_pred: node class predictions (positive, rows sum to 1).
    logits = jax.random.normal(k1, (N, C), jnp.float32)
    aug_pred = jax.nn.softmax(logits, axis=-1)

    # edge_index [2, E]: a ring (every node has >= 1 incoming edge) + random edges.
    ring_src = jnp.arange(N, dtype=jnp.int32)
    ring_dst = (ring_src + 1) % N
    rnd_src = jax.random.randint(k2, (E_EXTRA,), 0, N, jnp.int32)
    rnd_dst = jax.random.randint(k3, (E_EXTRA,), 0, N, jnp.int32)
    edge_index = jnp.stack(
        [jnp.concatenate([ring_src, rnd_src]),
         jnp.concatenate([ring_dst, rnd_dst])], axis=0)

    loss = neighbor_constrained_reg_loss(edge_index, aug_pred, TEMP)
    loss = jax.block_until_ready(loss)

    ref = _reference_loss(edge_index, aug_pred, TEMP)
    assert bool(jnp.isfinite(loss)), "loss is not finite"
    assert bool(jnp.allclose(loss, ref, rtol=1e-3, atol=1e-4)), (loss, ref)
    print("KERNEL_OK")
</pallas_src>

<mosaic_0001>
module attributes {stable_mosaic.version = 11 : i64} {
  func.func @_agg_sharpen_kernel(%arg0: i32, %arg1: i32, %arg2: memref<9x128xf32, #tpu.memory_space<vmem>>, %arg3: memref<128x128xi8, #tpu.memory_space<vmem>>, %arg4: memref<9x128xf32, #tpu.memory_space<vmem>>, %arg5: memref<8x128xf32, #tpu.memory_space<vmem>>, %arg6: memref<9x128xf32, #tpu.memory_space<vmem>>) attributes {dimension_semantics = [#tpu.dimension_semantics<parallel>, #tpu.dimension_semantics<arbitrary>], iteration_bounds = array<i64: 1, 1>, scalar_prefetch = 0 : i64, scratch_operands = 1 : i64, tpu.core_type = #tpu.core_type<tc>, window_params = [{pipeline_mode = #tpu.pipeline_mode<synchronous>, transform_indices = @transform_0, window_bounds = array<i64: 9, 128>}, {transform_indices = @transform_1, window_bounds = array<i64: 128, 128>}, {transform_indices = @transform_2, window_bounds = array<i64: 9, 128>}, {transform_indices = @transform_3, window_bounds = array<i64: 8, 128>}]} {
    %c0_i32 = arith.constant 0 : i32
    %0 = arith.cmpi eq, %arg1, %c0_i32 : i32
    %1 = arith.extui %0 : i1 to i32
    %c0_i32_0 = arith.constant 0 : i32
    %2 = arith.cmpi ne, %1, %c0_i32_0 : i32
    scf.if %2 {
      %cst_10 = arith.constant 0.000000e+00 : f32
      %22 = vector.broadcast %cst_10 : f32 to vector<9x128xf32>
      %c0_11 = arith.constant 0 : index
      %c0_12 = arith.constant 0 : index
      %23 = vector.load %arg6[%c0_11, %c0_12] : memref<9x128xf32, #tpu.memory_space<vmem>>, vector<9x128xf32>
      tpu.vector_store %arg6[%c0_11, %c0_12], %22 {strides = array<i32>} : memref<9x128xf32, #tpu.memory_space<vmem>>, vector<9x128xf32>,
    } else {
    }
    %c128_i32 = arith.constant 128 : i32
    %3 = arith.muli %arg1, %c128_i32 : i32
    %4 = tpu.assume_multiple %3, 128 : i32
    %c0 = arith.constant 0 : index
    %5 = arith.index_cast %4 : i32 to index
    %6 = vector.load %arg2[%c0, %5] : memref<9x128xf32, #tpu.memory_space<vmem>>, vector<9x128xf32>
    %7 = arith.truncf %6 : vector<9x128xf32> to vector<9x128xbf16>
    %8 = arith.extf %7 : vector<9x128xbf16> to vector<9x128xf32>
    %9 = arith.subf %6, %8 : vector<9x128xf32>
    %10 = arith.truncf %9 : vector<9x128xf32> to vector<9x128xbf16>
    %c0_1 = arith.constant 0 : index
    %c0_2 = arith.constant 0 : index
    %11 = vector.load %arg3[%c0_1, %c0_2] : memref<128x128xi8, #tpu.memory_space<vmem>>, vector<128x128xi8>
    %12 = arith.sitofp %11 : vector<128x128xi8> to vector<128x128xbf16>
    %c0_3 = arith.constant 0 : index
    %c0_4 = arith.constant 0 : index
    %13 = vector.load %arg6[%c0_3, %c0_4] : memref<9x128xf32, #tpu.memory_space<vmem>>, vector<9x128xf32>
    %cst = arith.constant dense<0.000000e+00> : vector<9x128xf32>
    %14 = tpu.matmul %7, %12, %cst {dimension_numbers = #tpu.dot_dimension_numbers<[1], [0], [0], [1], [0, 0, 1, 1], [], []>} : vector<9x128xbf16>, vector<128x128xbf16>, vector<9x128xf32> -> vector<9x128xf32>
    %cst_5 = arith.constant dense<0.000000e+00> : vector<9x128xf32>
    %15 = tpu.matmul %10, %12, %cst_5 {dimension_numbers = #tpu.dot_dimension_numbers<[1], [0], [0], [1], [0, 0, 1, 1], [], []>} : vector<9x128xbf16>, vector<128x128xbf16>, vector<9x128xf32> -> vector<9x128xf32>
    %16 = arith.addf %14, %15 : vector<9x128xf32>
    %17 = arith.addf %13, %16 : vector<9x128xf32>
    %c0_6 = arith.constant 0 : index
    %c0_7 = arith.constant 0 : index
    %18 = vector.load %arg6[%c0_6, %c0_7] : memref<9x128xf32, #tpu.memory_space<vmem>>, vector<9x128xf32>
    tpu.vector_store %arg6[%c0_6, %c0_7], %17 {strides = array<i32>} : memref<9x128xf32, #tpu.memory_space<vmem>>, vector<9x128xf32>,
    %c0_i32_8 = arith.constant 0 : i32
    %19 = arith.cmpi eq, %arg1, %c0_i32_8 : i32
    %20 = arith.extui %19 : i1 to i32
    %c0_i32_9 = arith.constant 0 : i32
    %21 = arith.cmpi ne, %20, %c0_i32_9 : i32
    scf.if %21 {
      %c0_10 = arith.constant 0 : index
      %c0_11 = arith.constant 0 : index
      %22 = vector.load %arg6[%c0_10, %c0_11] : memref<9x128xf32, #tpu.memory_space<vmem>>, vector<9x128xf32>
      %23 = vector.extract_strided_slice %22 {offsets = [0, 0], sizes = [8, 128], strides = [1, 1]} : vector<9x128xf32> to vector<8x128xf32>
      %24 = vector.extract_strided_slice %22 {offsets = [8, 0], sizes = [1, 128], strides = [1, 1]} : vector<9x128xf32> to vector<1x128xf32>
      %cst_12 = arith.constant 1.000000e+00 : f32
      %25 = vector.broadcast %cst_12 : f32 to vector<1x128xf32>
      %26 = arith.maximumf %24, %25 : vector<1x128xf32>
      %27 = vector.broadcast %26 : vector<1x128xf32> to vector<8x128xf32>
      %28 = arith.divf %23, %27 : vector<8x128xf32>
      %cst_13 = arith.constant 1.000000e-10 : f32
      %29 = vector.broadcast %cst_13 : f32 to vector<8x128xf32>
      %30 = arith.addf %28, %29 : vector<8x128xf32>
      %31 = math.log %30 : vector<8x128xf32>
      %c0_14 = arith.constant 0 : index
      %c0_15 = arith.constant 0 : index
      %32 = vector.load %arg5[%c0_14, %c0_15] : memref<8x128xf32, #tpu.memory_space<vmem>>, vector<8x128xf32>
      tpu.vector_store %arg5[%c0_14, %c0_15], %31 {strides = array<i32>} : memref<8x128xf32, #tpu.memory_space<vmem>>, vector<8x128xf32>,
      %cst_16 = arith.constant 1.000000e-30 : f32
      %33 = vector.broadcast %cst_16 : f32 to vector<8x128xf32>
      %34 = arith.maximumf %28, %33 : vector<8x128xf32>
      %35 = math.log %34 : vector<8x128xf32>
      %cst_17 = arith.constant 2.000000e+00 : f32
      %36 = vector.broadcast %cst_17 : f32 to vector<8x128xf32>
      %37 = arith.mulf %36, %35 : vector<8x128xf32>
      %38 = math.exp %37 : vector<8x128xf32>
      %cst_18 = arith.constant dense<0.000000e+00> : vector<128xf32>
      %39 = vector.multi_reduction <add>, %38, %cst_18 [0] : vector<8x128xf32> to vector<128xf32>
      %40 = vector.shape_cast %39 : vector<128xf32> to vector<1x128xf32>
      %cst_19 = arith.constant 1.000000e-30 : f32
      %41 = vector.broadcast %cst_19 : f32 to vector<1x128xf32>
      %42 = arith.maximumf %40, %41 : vector<1x128xf32>
      %43 = vector.broadcast %42 : vector<1x128xf32> to vector<8x128xf32>
      %44 = arith.divf %38, %43 : vector<8x128xf32>
      %cst_20 = arith.constant 1.000000e-10 : f32
      %45 = vector.broadcast %cst_20 : f32 to vector<8x128xf32>
      %46 = arith.addf %44, %45 : vector<8x128xf32>
      %47 = math.log %46 : vector<8x128xf32>
      %48 = arith.mulf %46, %47 : vector<8x128xf32>
      %cst_21 = arith.constant dense<0.000000e+00> : vector<128xf32>
      %49 = vector.multi_reduction <add>, %48, %cst_21 [0] : vector<8x128xf32> to vector<128xf32>
      %50 = vector.shape_cast %49 : vector<128xf32> to vector<1x128xf32>
      %51 = arith.mulf %24, %50 : vector<1x128xf32>
      %52 = tpu.concatenate %46, %51 in 0 : vector<8x128xf32>, vector<1x128xf32> -> vector<9x128xf32>
      %c0_22 = arith.constant 0 : index
      %c0_23 = arith.constant 0 : index
      %53 = vector.load %arg4[%c0_22, %c0_23] : memref<9x128xf32, #tpu.memory_space<vmem>>, vector<9x128xf32>
      tpu.vector_store %arg4[%c0_22, %c0_23], %52 {strides = array<i32>} : memref<9x128xf32, #tpu.memory_space<vmem>>, vector<9x128xf32>,
    } else {
    }
    return
  }
  func.func @transform_0(%arg0: i32, %arg1: i32) -> (i32, i32) {
    %c0_i32 = arith.constant 0 : i32
    %c0_i32_0 = arith.constant 0 : i32
    %c0_i32_1 = arith.constant 0 : i32
    return %c0_i32, %c0_i32_0 : i32, i32
  }
  func.func @transform_1(%arg0: i32, %arg1: i32) -> (i32, i32) {
    %c0_i32 = arith.constant 0 : i32
    return %arg1, %arg0 : i32, i32
  }
  func.func @transform_2(%arg0: i32, %arg1: i32) -> (i32, i32) {
    %c0_i32 = arith.constant 0 : i32
    %c0_i32_0 = arith.constant 0 : i32
    return %c0_i32, %arg0 : i32, i32
  }
  func.func @transform_3(%arg0: i32, %arg1: i32) -> (i32, i32) {
    %c0_i32 = arith.constant 0 : i32
    %c0_i32_0 = arith.constant 0 : i32
    return %c0_i32, %arg0 : i32, i32
  }
}

</mosaic_0001>

<bundles_post_ra>
// kernel: tpu_custom_call.1
= control target key start
LH: loop header
LB: loop body
LE: loop exit
PB: predicated region body
PF: predicated region fallthrough
CT: control target
= control target key end

     0   :  { %9 = vsyncpa [#allocation4], 0  ;;  %s498_s0 = inlined_call_operand.hbm [shape: f32[9,128], index: 0, kind: input, shape index: {}]   ;;  %s499_s1 = inlined_call_operand.hbm [shape: s8[128,128], index: 1, kind: input, shape index: {}]   ;;  %s500_s2 = inlined_call_operand.hbm [shape: f32[9,128], index: 2, kind: output, shape index: {0}]   ;;  %s501_s3 = inlined_call_operand.hbm [shape: f32[8,128], index: 3, kind: output, shape index: {1}]  }
   0x1   :  { %10 = vsyncpa [#allocation7], 0 }
   0x2   :  { %11 = vsyncpa [#allocation5], 0 }
   0x3   :  { %12 = vsyncpa [#allocation10], 0  ;;  %s413_s12 = smov [#allocation3]   ;;  %s317_s16 = scalar_lea.hbm %s498_s0, 256 }
   0x4   :  { %s18_s13 = sshll.u32 %s413_s12, 4  ;;  %p318_p0 = scmp.ne.s32.totalorder %s498_s0, %s317_s16  ;;  %s19_s13 = int_to_ptr.vmem [resolvable:$true] %s18_s13 }
   0x5   :  { %p321_p1 = scmp.lt.u32.totalorder %s317_s16, %s498_s0 }
   0x7   :  { %p323_p2 = pnand %p321_p1, %p318_p0 }
   0x9   :  { %326 = shalt.err (!%p323_p2)
}
   0xa   :  { %s327_s21 = scalar_lea.vmem %s19_s13, 256  ;;  %p332_p4 = scmp.lt.s32.totalorder %s19_s13, %s19_s13 }
   0xb   :  { %p328_p3 = scmp.ne.s32.totalorder %s19_s13, %s327_s21  ;;  %p333_p5 = scmp.lt.s32.totalorder %s327_s21, %s327_s21 }
   0xd   :  { %p334_p6 = por %p333_p5, %p332_p4 }
   0xf   :  { %p335_p7 = pnand %p334_p6, %p328_p3 }
  0x11   :  { %338 = shalt.err (!%p335_p7)
}
  0x12   :  { %s414_s22 = smov 128   ;;  %s415_s23 = smov 8  }
  0x13   :  { %24 = dma.hbm_to_vmem [thread:$0]  %s498_s0, 256, %s19_s13, [#allocation4], %s414_s22, %s414_s22, %s415_s23  }
  0x14   :  { %s416_s26 = smov [#allocation6]   ;;  %s339_s30 = scalar_lea.hbm %s499_s1, 512 }
  0x15   :  { %s30_s27 = sshll.u32 %s416_s26, 4  ;;  %p340_p8 = scmp.ne.s32.totalorder %s499_s1, %s339_s30  ;;  %s31_s27 = int_to_ptr.vmem [resolvable:$true] %s30_s27 }
  0x16   :  { %p343_p9 = scmp.lt.u32.totalorder %s339_s30, %s499_s1 }
  0x18   :  { %p345_p10 = pnand %p343_p9, %p340_p8 }
  0x1a   :  { %348 = shalt.err (!%p345_p10)
}
  0x1b   :  { %s349_s8 = scalar_lea.vmem %s31_s27, 512  ;;  %p354_p12 = scmp.lt.s32.totalorder %s31_s27, %s31_s27 }
  0x1c   :  { %p350_p11 = scmp.ne.s32.totalorder %s31_s27, %s349_s8  ;;  %p355_p13 = scmp.lt.s32.totalorder %s349_s8, %s349_s8 }
  0x1e   :  { %p356_p0 = por %p355_p13, %p354_p12 }
  0x20   :  { %p357_p1 = pnand %p356_p0, %p350_p11 }
  0x22   :  { %360 = shalt.err (!%p357_p1)
}
  0x23   :  { %36 = dma.hbm_to_vmem [thread:$0]  %s499_s1, 512, %s31_s27, [#allocation7], %s414_s22, %s414_s22, %s415_s23  }
  0x24   :  { %405 = dma.done.wait [#allocation4], 256  }
  0x25   :  { %406 = vsyncadd [#allocation4], 4294967040 }
  0x26   :  { %407 = dma.done.wait [#allocation7], 512  }
  0x27   :  { %408 = vsyncadd [#allocation7], 4294966784  ;;  %v417_v0 = vmov 0.0   ;;  %vm418_vm0 = vmmov 0   ;;  %v62_v1 = vld [vmem:[#allocation6] sm:$0xff]  ;;  %v63_v4 = vld [vmem:[#allocation6 + $0x8] sm:$0xff]  ;;  %v168_v33 = vlaneseq }
  0x28   :  { %257 = vmatprep.subr.bf16.mxu0 %v417_v0  ;;  %49 = vst [vmem:[#allocation2 + $0x8] sm:$0x1] %v417_v0  ;;  %277 = vmatprep.subr.bf16.mxu1 %v417_v0  ;;  %v66_v2 = vunpack.c.l.s8.bf16 %v62_v1  ;;  %v67_v3 = vunpack.c.h.s8.bf16 %v62_v1  ;;  %v68_v5 = vunpack.c.l.s8.bf16 %v63_v4  ;;  %v69_v6 = vunpack.c.h.s8.bf16 %v63_v4  ;;  %v64_v7 = vld [vmem:[#allocation6 + $0x10] sm:$0xff]  ;;  %v55_v10 = vld [vmem:[#allocation3 + $0x8] sm:$0x1]  ;;  %s419_s1 = smov [#allocation9]  }
  0x29   :  { %273 = vmatprep.mubr.msk.bf16.mxu0 %vm418_vm0, %v417_v0  ;;  %293 = vmatprep.mubr.msk.bf16.mxu1 %vm418_vm0, %v417_v0  ;;  %v70_v8 = vunpack.c.l.s8.bf16 %v64_v7  ;;  %v54_v9 = vld [vmem:[#allocation3] sm:$0xff]  ;;  %v71_v12 = vunpack.c.h.s8.bf16 %v64_v7  ;;  %v65_v13 = vld [vmem:[#allocation6 + $0x18] sm:$0xff]  ;;  %v169_v34 = vshrl.u32 %v168_v33, 7  ;;  %s224_s10 = sshll.u32 %s419_s1, 4  ;;  %s225_s10 = int_to_ptr.vmem [resolvable:$true] %s224_s10 }
  0x2a   :  { %258 = vmatpush3.bf16.msra.mxu0 %v66_v2  ;;  %278 = vmatpush3.bf16.msra.mxu1 %v66_v2  ;;  %v56_v11 = vpack.c.bf16 %v55_v10, %v54_v9  ;;  %v72_v16 = vunpack.c.l.s8.bf16 %v65_v13  ;;  %v73_v19 = vunpack.c.h.s8.bf16 %v65_v13  ;;  %s361_s11 = scalar_lea.vmem %s225_s10, 128  ;;  %p366_p3 = scmp.lt.s32.totalorder %s225_s10, %s225_s10 }
  0x2b   :  { %259 = vmatprep.subr.bf16.mxu0 %v417_v0  ;;  %279 = vmatprep.subr.bf16.mxu1 %v417_v0  ;;  %v170_v35 = vsub.s32 0, %v169_v34  ;;  %p362_p2 = scmp.ne.s32.totalorder %s225_s10, %s361_s11  ;;  %p367_p4 = scmp.lt.s32.totalorder %s361_s11, %s361_s11 }
  0x2c   :  { %v57_v14 = vunpack.c.l.bf16 %v56_v11  ;;  %v58_v15 = vunpack.c.h.bf16 %v56_v11 }
  0x2d   :  { %p368_p5 = por %p367_p4, %p366_p3 }
  0x2e   :  { %260 = vmatpush3.bf16.msra.mxu0 %v67_v3  ;;  %280 = vmatpush3.bf16.msra.mxu1 %v67_v3  ;;  %v59_v17 = vsub.f32 %v54_v9, %v57_v14  ;;  %v60_v18 = vsub.f32 %v55_v10, %v58_v15 }
  0x2f   :  { %261 = vmatprep.subr.bf16.mxu0 %v417_v0  ;;  %281 = vmatprep.subr.bf16.mxu1 %v417_v0  ;;  %v75_v27 = vld [vmem:[#allocation2 + $0x8] sm:$0x1]  ;;  %p369_p6 = pnand %p368_p5, %p362_p2 }
  0x30   :  { %v61_v20 = vpack.c.bf16 %v60_v18, %v59_v17 }
  0x32   :  { %262 = vmatpush3.bf16.msra.mxu0 %v68_v5  ;;  %282 = vmatpush3.bf16.msra.mxu1 %v68_v5 }
  0x33   :  { %263 = vmatprep.subr.bf16.mxu0 %v417_v0  ;;  %283 = vmatprep.subr.bf16.mxu1 %v417_v0 }
  0x36   :  { %264 = vmatpush3.bf16.msra.mxu0 %v69_v6  ;;  %284 = vmatpush3.bf16.msra.mxu1 %v69_v6 }
  0x37   :  { %265 = vmatprep.subr.bf16.mxu0 %v417_v0  ;;  %285 = vmatprep.subr.bf16.mxu1 %v417_v0 }
  0x3a   :  { %266 = vmatpush3.bf16.msra.mxu0 %v70_v8  ;;  %286 = vmatpush3.bf16.msra.mxu1 %v70_v8 }
  0x3b   :  { %267 = vmatprep.subr.bf16.mxu0 %v417_v0  ;;  %287 = vmatprep.subr.bf16.mxu1 %v417_v0 }
  0x3e   :  { %268 = vmatpush3.bf16.msra.mxu0 %v71_v12  ;;  %288 = vmatpush3.bf16.msra.mxu1 %v71_v12 }
  0x3f   :  { %269 = vmatprep.subr.bf16.mxu0 %v417_v0  ;;  %289 = vmatprep.subr.bf16.mxu1 %v417_v0 }
  0x42   :  { %270 = vmatpush3.bf16.msra.mxu0 %v72_v16  ;;  %290 = vmatpush3.bf16.msra.mxu1 %v72_v16 }
  0x43   :  { %271 = vmatprep.subr.bf16.mxu0 %v417_v0  ;;  %291 = vmatprep.subr.bf16.mxu1 %v417_v0 }
  0x46   :  { %272 = vmatpush3.bf16.msra.mxu0 %v73_v19  ;;  %292 = vmatpush3.bf16.msra.mxu1 %v73_v19 }
  0x49   :  { %274 = vmatmul.mubr.bf16.vlgmr.msra.gmra.mrb[0].mxu0 %v61_v20  ;;  %294 = vmatmul.mubr.bf16.vlgmr.msra.gmra.mrb[0].mxu1 %v56_v11 }
 0x11c   :  { %v110_v21 = vpop.f32.mrb[0].mxu0  ;;  %v151_v22 = vpop.f32.mrb[0].mxu1 }
 0x11d   :  { %v152_v23 = vadd.f32 %v151_v22, %v110_v21  ;;  %v275_v24 = vpop.f32.mrb[1].mxu0  ;;  %v295_v25 = vpop.f32.mrb[1].mxu1 }
 0x11e   :  { %v113_v26 = vpop.f32.mrb[2].mxu0  ;;  %v154_v28 = vpop.f32.mrb[2].mxu1 }
 0x11f   :  { %v155_v29 = vadd.f32 %v154_v28, %v113_v26  ;;  %v276_v30 = vpop.f32.mrb[3].mxu0  ;;  %v296_v31 = vpop.f32.mrb[3].mxu1 }
 0x121   :  { %v159_v32 = vadd.f32 %v155_v29, %v75_v27 }
 0x123   :  { %161 = vst [vmem:[#allocation2 + $0x8] sm:$0x1] %v159_v32 }
 0x12a   :  { %v166_v36 = vld [vmem:[#allocation2 + $0x8] sm:$0x1] }
 0x12b   :  { %v167_v37 = vmax.f32 %v166_v36, 1.0 }
 0x12d   :  { %v171_v38 = vrot.slane %v167_v37, %v170_v35 }
 0x12f   :  { %305 = vrcp.f32 %v171_v38 }
 0x139   :  { %v306_v39 = vpop.eup %305 }
 0x13a   :  { %v173_v40 = vmul.f32 %v306_v39, %v152_v23 }
 0x13c   :  { %v178_v41 = vmax.f32 %v173_v40, 1e-30  ;;  %v174_v42 = vadd.f32 1e-10, %v173_v40 }
 0x13e   :  { %307 = vlog2.f32 %v178_v41 }
 0x13f   :  { %309 = vlog2.f32 %v174_v42 }
 0x148   :  { %v308_v43 = vpop.eup %307 }
 0x149   :  { %v310_v44 = vpop.eup %309  ;;  %v180_v45 = vmul.f32 0.6931472, %v308_v43 }
 0x14a   :  { %v176_v46 = vmul.f32 0.6931472, %v310_v44 }
 0x14b   :  { %v181_v47 = vmul.f32 2.0, %v180_v45 }
 0x14c   :  { %177 = vst [vmem:[#allocation9] sm:$0xff] %v176_v46 }
 0x14d   :  { %v182_v48 = vmul.f32 1.442695, %v181_v47 }
 0x14e   :  { %372 = shalt.err (!%p369_p6)
}
 0x14f   :  { %s373_s14 = scalar_lea.hbm %s501_s3, 128 }
 0x150   :  { %p374_p7 = scmp.ne.s32.totalorder %s501_s3, %s373_s14  ;;  %p377_p8 = scmp.lt.u32.totalorder %s373_s14, %s501_s3 }
 0x152   :  { %p379_p9 = pnand %p377_p8, %p374_p7 }
 0x154   :  { %382 = shalt.err (!%p379_p9)
}
 0x155   :  { %227 = dma.vmem_to_hbm [thread:$0]  %s225_s10, 128, %s501_s3, [#allocation10]   ;;  %311 = vpow2.f32 %v182_v48 }
 0x156   :  { %s420_s3 = smov [#allocation8]  }
 0x157   :  { %s211_s21 = sshll.u32 %s420_s3, 4  ;;  %s212_s21 = int_to_ptr.vmem [resolvable:$true] %s211_s21 }
 0x158   :  { %s383_s24 = scalar_lea.vmem %s212_s21, 256  ;;  %p388_p11 = scmp.lt.s32.totalorder %s212_s21, %s212_s21 }
 0x159   :  { %p384_p10 = scmp.ne.s32.totalorder %s212_s21, %s383_s24  ;;  %p389_p12 = scmp.lt.s32.totalorder %s383_s24, %s383_s24 }
 0x15b   :  { %p390_p13 = por %p389_p12, %p388_p11 }
 0x15d   :  { %p391_p0 = pnand %p390_p13, %p384_p10 }
 0x15f   :  { %v312_v49 = vpop.eup %311 }
 0x160   :  { %v184_v50 = vrot.slane %v312_v49, 4 }
 0x162   :  { %v185_v51 = vadd.f32 %v312_v49, %v184_v50 }
 0x164   :  { %v186_v52 = vrot.slane %v185_v51, 2 }
 0x166   :  { %v187_v53 = vadd.f32 %v186_v52, %v185_v51 }
 0x168   :  { %v188_v54 = vrot.slane %v187_v53, 1 }
 0x16a   :  { %v189_v55 = vadd.f32 %v188_v54, %v187_v53 }
 0x16c   :  { %v190_v56 = vmax.f32 %v189_v55, 1e-30 }
 0x16e   :  { %313 = vrcp.f32 %v190_v56 }
 0x178   :  { %v314_v57 = vpop.eup %313 }
 0x179   :  { %v192_v58 = vmul.f32 %v314_v57, %v312_v49 }
 0x17b   :  { %v193_v59 = vadd.f32 1e-10, %v192_v58 }
 0x17d   :  { %315 = vlog2.f32 %v193_v59  ;;  %204 = vst [vmem:[#allocation8] sm:$0xff] %v193_v59 }
 0x187   :  { %v316_v60 = vpop.eup %315 }
 0x188   :  { %v195_v61 = vmul.f32 0.6931472, %v316_v60 }
 0x18a   :  { %v196_v62 = vmul.f32 %v195_v61, %v193_v59 }
 0x18c   :  { %v197_v63 = vrot.slane %v196_v62, 4 }
 0x18e   :  { %v198_v0 = vadd.f32 %v197_v63, %v196_v62 }
 0x190   :  { %v199_v1 = vrot.slane %v198_v0, 2 }
 0x192   :  { %v200_v2 = vadd.f32 %v199_v1, %v198_v0 }
 0x194   :  { %v201_v3 = vrot.slane %v200_v2, 1 }
 0x196   :  { %v202_v4 = vadd.f32 %v201_v3, %v200_v2 }
 0x198   :  { %v203_v5 = vmul.f32 %v202_v4, %v166_v36 }
 0x19a   :  { %205 = vst [vmem:[#allocation8 + $0x8] sm:$0x1] %v203_v5 }
 0x19b   :  { %394 = shalt.err (!%p391_p0)
}
 0x19c   :  { %s395_s27 = scalar_lea.hbm %s500_s2, 256 }
 0x19d   :  { %p396_p1 = scmp.ne.s32.totalorder %s500_s2, %s395_s27  ;;  %p399_p2 = scmp.lt.u32.totalorder %s395_s27, %s500_s2 }
 0x19f   :  { %p401_p3 = pnand %p399_p2, %p396_p1 }
 0x1a1   :  { %404 = shalt.err (!%p401_p3)
}
 0x1a2   :  { %217 = dma.vmem_to_hbm [thread:$0]  %s212_s21, 256, %s500_s2, [#allocation5], %s414_s22, %s414_s22, %s415_s23  }
 0x1a3   :  { %409 = dma.done.wait [#allocation5], 256  }
 0x1a4   :  { %410 = vsyncadd [#allocation5], 4294967040 }
 0x1a5   :  { %411 = dma.done.wait [#allocation10], 128  }
 0x1a6   :  { %412 = vsyncadd [#allocation10], 4294967168 }
 0x1a7   :  { %234 = vsyncpa [#allocation4], 1 }
 0x1a8   :  { %235 = vsyncpa [#allocation7], 1 }
 0x1a9   :  { %236 = vsyncpa [#allocation5], 1 }
 0x1aa   :  { %237 = vsyncpa [#allocation10], 1 }

</bundles_post_ra>
